<compile_context>
chip_gen: v7x
topology: tpu7x:2x2x1
jax: 0.10.0
libtpu: 0.0.40
codegen_flags: <defaults>
</compile_context>

<pallas_src>
import functools

import jax
import jax.numpy as jnp
from jax.experimental import pallas as pl
from jax.experimental.pallas import tpu as pltpu


# ------------------------------ in-kernel helpers ------------------------------

def _col_index(L, W):
    """Column-within-row index for each flattened position: (1, L) int32, built in-kernel."""
    flat = jax.lax.broadcasted_iota(jnp.int32, (1, L), 1)
    return flat % W


def _width_shift(x, col, dw, W, L):
    """Circular shift by dw columns within each row of the flattened (C, H*W) image."""
    if dw == 0:
        return x
    if dw > 0:
        return jnp.where(col < (W - dw),
                         pltpu.roll(x, L - dw, axis=1),     # x[i + dw]
                         pltpu.roll(x, W - dw, axis=1))     # x[i + dw - W] (wrap in row)
    d = -dw
    return jnp.where(col >= d,
                     pltpu.roll(x, d, axis=1),              # x[i - d]
                     pltpu.roll(x, L + d - W, axis=1))      # x[i - d + W] (wrap in row)


def _height_shift(y, dh, W, L):
    """Circular shift by dh rows = exact flat lane roll by a multiple of W."""
    if dh == 0:
        return y
    return pltpu.roll(y, (L - dh * W) % L, axis=1)          # x[i + dh*W]


# ---------------------------------- kernels ----------------------------------

def _conv_kernel_stacked(x_ref, w_ref, b_ref, o_ref, pmat_ref, *, C, H, W, K, p):
    # x_ref:    (1, C, L)   lane-dense flattened image (C sublane-aligned)
    # w_ref:    (OB, K*K*C) lane-dense weights (taps folded into the contraction)
    # b_ref:    (OB, 1)     bias (f32)
    # o_ref:    (1, OB, L)  lane-dense output block
    # pmat_ref: (K*K*C, L)  VMEM patch cache in the MXU dtype
    L = H * W

    # The rolls / selects depend only on the batch index, so rebuild the patch cache only on
    # the first output-channel block of each batch step.  The ob axis is "arbitrary" (not
    # megacore-sharded), so every core sees ob == 0 first for each n -> guard is safe.
    @pl.when(pl.program_id(1) == 0)
    def _build():
        x = x_ref[0, :, :]                                  # (C, L), input dtype
        col = _col_index(L, W)                              # (1, L) int32, in-kernel iota
        for kw in range(K):                                 # width shift reused across kh
            xs = _width_shift(x, col, kw - p, W, L)
            for kh in range(K):
                tap = kh * K + kw                           # matches weight layout
                y = _height_shift(xs, kh - p, W, L)
                pmat_ref[tap * C:(tap + 1) * C, :] = y.astype(pmat_ref.dtype)

    acc = jnp.dot(w_ref[...], pmat_ref[...], preferred_element_type=jnp.float32)
    acc = acc + b_ref[...].astype(jnp.float32)
    o_ref[0, ...] = acc.astype(o_ref.dtype)


def _conv_kernel_pertap(x_ref, w_ref, b_ref, o_ref, *, C, H, W, K, p, mxu_dtype):
    # x_ref: (1, C, L); w_ref: (K*K, OB, C); b_ref: (OB, 1); o_ref: (1, OB, L)
    # No (K*K*C, L) materialization: each tap's shifted tile is generated, cast and fed to
    # the MXU immediately, keeping temporary VMEM/vreg pressure ~O(C*L).
    L = H * W
    OB = o_ref.shape[1]
    x = x_ref[0, :, :]
    col = _col_index(L, W)
    acc = jnp.zeros((OB, L), jnp.float32)
    for kw in range(K):                                     # width shift reused across kh
        xs = _width_shift(x, col, kw - p, W, L)
        for kh in range(K):
            tap = kh * K + kw
            y = _height_shift(xs, kh - p, W, L).astype(mxu_dtype)
            acc = acc + jnp.dot(w_ref[tap, :, :], y, preferred_element_type=jnp.float32)
    o_ref[0, ...] = (acc + b_ref[...].astype(jnp.float32)).astype(o_ref.dtype)


# ---------------------------------- wrapper ----------------------------------

def repeating_conv(x, weight, bias, conv_size, *, mxu_dtype=None, force_path=None):
    """Circular ("repeating") pad + Conv2d(stride=1, pad=0); PyTorch-NCHW-equivalent output.

    mxu_dtype:  dtype fed to the MXU (default: x.dtype). jnp.bfloat16 gives ~2x MXU rate on
                v6e/v7x and halves patch-cache VMEM; accumulation stays f32.
    force_path: None | "stacked" | "pertap"  (testing hook for the two compute paths).
    """
    N, C, H, W = x.shape
    O = weight.shape[0]
    K = conv_size
    p = 0 if K == 1 else (K - 1) // 2
    L = H * W
    out_dtype = x.dtype
    if mxu_dtype is None:
        mxu_dtype = x.dtype

    # Sublane-align the channel (contraction) dim so tap slices / writes are aligned.
    C_pad = max(8, ((C + 7) // 8) * 8)
    if C_pad != C:
        x = jnp.pad(x, ((0, 0), (0, C_pad - C), (0, 0), (0, 0)))
        weight = jnp.pad(weight, ((0, 0), (0, C_pad - C), (0, 0), (0, 0)))
    KKC = K * K * C_pad

    x_flat = x.reshape(N, C_pad, L)                         # lane-dense, free reshape
    b2 = bias.reshape(O, 1).astype(jnp.float32)

    # Output-channel block aligned to the native MXU result tile (256 on v6e/v7x, 128 on
    # v5e).  When O is small the kernel is XLU/VPU/DMA-bound anyway, so just take O.
    if O % 256 == 0:
        OB = 256
    elif O % 128 == 0:
        OB = 128
    else:
        OB = O

    # ------- per-generation VMEM budget (64 MiB on v7x, 128 MiB on v5e/v6e) -------
    try:
        vmem_cap = int(pltpu.get_tpu_info().vmem_capacity_bytes)
    except Exception:
        vmem_cap = 64 * 1024 * 1024
    isz = jnp.dtype(x.dtype).itemsize
    msz = jnp.dtype(mxu_dtype).itemsize
    osz = jnp.dtype(out_dtype).itemsize
    pmat_bytes = KKC * L * msz

    # Cache the K*K shifted patches when they fit comfortably; otherwise fall back to
    # per-tap accumulation (avoids the K^2 VMEM blowup that is fatal under v7x's 64 MiB).
    patch_budget = min(vmem_cap // 4, 16 * 1024 * 1024)
    if force_path is not None:
        use_stacked = (force_path == "stacked")
    else:
        use_stacked = (C_pad < 64) or (pmat_bytes <= patch_budget)

    blocks_bytes = 2 * (C_pad * L * isz           # x block (double-buffered)
                        + OB * KKC * msz          # weight block
                        + OB * 128 * 4            # bias block (lane-padded)
                        + OB * L * osz)           # output block
    scratch_bytes = pmat_bytes if use_stacked else 0
    temps_bytes = 4 * C_pad * L * isz + (0 if use_stacked else OB * L * 4)
    needed = blocks_bytes + scratch_bytes + temps_bytes + (2 << 20)
    vmem_limit = int(min(0.9 * vmem_cap, max(needed, 32 * 1024 * 1024)))

    x_spec = pl.BlockSpec((1, C_pad, L), lambda n, ob: (n, 0, 0))   # no re-DMA across ob
    b_spec = pl.BlockSpec((OB, 1), lambda n, ob: (ob, 0))
    o_spec = pl.BlockSpec((1, OB, L), lambda n, ob: (n, ob, 0))

    if use_stacked:
        # taps folded into the contraction: w2[o, (kh*K + kw)*C + c] = weight[o, c, kh, kw]
        w2 = jnp.transpose(weight, (0, 2, 3, 1)).reshape(O, KKC).astype(mxu_dtype)
        kernel = functools.partial(_conv_kernel_stacked, C=C_pad, H=H, W=W, K=K, p=p)
        in_specs = [x_spec, pl.BlockSpec((OB, KKC), lambda n, ob: (ob, 0)), b_spec]
        scratch = [pltpu.VMEM((KKC, L), mxu_dtype)]
        dims = ("parallel", "arbitrary")       # ob sweeps 0..last per batch (patch cache)
        args = (x_flat, w2, b2)
    else:
        # per-tap layout: w3[kh*K + kw, o, c] = weight[o, c, kh, kw]
        w3 = jnp.transpose(weight, (2, 3, 0, 1)).reshape(K * K, O, C_pad).astype(mxu_dtype)
        kernel = functools.partial(_conv_kernel_pertap, C=C_pad, H=H, W=W, K=K, p=p,
                                   mxu_dtype=mxu_dtype)
        in_specs = [x_spec, pl.BlockSpec((K * K, OB, C_pad), lambda n, ob: (0, ob, 0)), b_spec]
        scratch = []
        dims = ("parallel", "parallel")
        args = (x_flat, w3, b2)

    out_flat = pl.pallas_call(
        kernel,
        out_shape=jax.ShapeDtypeStruct((N, O, L), out_dtype),
        grid_spec=pltpu.PrefetchScalarGridSpec(
            num_scalar_prefetch=0,
            grid=(N, O // OB),
            in_specs=in_specs,
            out_specs=o_spec,
            scratch_shapes=scratch,
        ),
        compiler_params=pltpu.CompilerParams(
            dimension_semantics=dims,
            vmem_limit_bytes=vmem_limit,
        ),
    )(*args)

    out = out_flat.reshape(N, O, H, W)
    # Even conv_size: PyTorch pads by (K-1)//2 per side so the output shrinks; the circular
    # result cropped to the top-left corner matches it exactly (odd K: no crop).
    Ho = H + 2 * p - K + 1
    Wo = W + 2 * p - K + 1
    if (Ho, Wo) != (H, W):
        out = out[:, :, :Ho, :Wo]
    return out


# ----------------------------- pure-JAX reference -----------------------------

def pad_repeating(x, pad):
    if pad == 0:
        return x
    H, W = x.shape[2], x.shape[3]
    x1 = jnp.concatenate([x[:, :, H - pad:H, :], x, x[:, :, 0:pad, :]], axis=2)
    x2 = jnp.concatenate([x1[:, :, :, W - pad:W], x1, x1[:, :, :, 0:pad]], axis=3)
    return x2


def _reference(x, weight, bias, conv_size):
    pad = 0 if conv_size == 1 else (conv_size - 1) // 2
    xp = pad_repeating(x, pad)
    out = jax.lax.conv_general_dilated(
        xp, weight, window_strides=(1, 1), padding="VALID",
        dimension_numbers=("NCHW", "OIHW", "NCHW"))
    return out + bias.reshape(1, -1, 1, 1)


# ------------------------------------ main ------------------------------------

if __name__ == "__main__":
    # small shapes: batch=2, in_channels=4, out_channels=8, spatial=16x16
    N, Cin, Cout, HW = 2, 4, 8, 16

    def make_inputs(seed, cin, cout, k):
        kx, kw_, kb = jax.random.split(jax.random.PRNGKey(seed), 3)
        xin = jax.random.normal(kx, (N, cin, HW, HW), dtype=jnp.float32)
        bound = 1.0 / jnp.sqrt(jnp.float32(cin * k * k))
        w = jax.random.uniform(kw_, (cout, cin, k, k), minval=-bound, maxval=bound,
                               dtype=jnp.float32)
        b = jax.random.uniform(kb, (cout,), minval=-bound, maxval=bound, dtype=jnp.float32)
        return xin, w, b

    x, w, b = make_inputs(0, Cin, Cout, 3)
    ref = _reference(x, w, b, 3)

    # 1) default: stacked patch-cache path, f32 MXU
    out = jax.block_until_ready(repeating_conv(x, w, b, 3))
    assert out.shape == ref.shape == (N, Cout, HW, HW)
    assert jnp.allclose(out, ref, atol=1e-4, rtol=1e-4)

    # 2) per-tap accumulate path (the large-C / v7x-safe path), forced at small shapes
    out_pt = jax.block_until_ready(repeating_conv(x, w, b, 3, force_path="pertap"))
    assert jnp.allclose(out_pt, ref, atol=1e-4, rtol=1e-4)

    # 3) bf16 MXU feed (v6e/v7x fast path), f32 accumulation — looser tolerance
    out_bf = jax.block_until_ready(repeating_conv(x, w, b, 3, mxu_dtype=jnp.bfloat16))
    assert jnp.allclose(out_bf, ref, atol=5e-2, rtol=5e-2)

    # 4) conv_size = 1 (pass-through conv) and even conv_size = 2 (cropped output)
    for k in (1, 2):
        xk, wk, bk = make_inputs(k, Cin, Cout, k)
        ok = jax.block_until_ready(repeating_conv(xk, wk, bk, k))
        rk = _reference(xk, wk, bk, k)
        assert ok.shape == rk.shape
        assert jnp.allclose(ok, rk, atol=1e-4, rtol=1e-4)

    print("KERNEL_OK")
</pallas_src>

<mosaic_0001>
module attributes {stable_mosaic.version = 11 : i64} {
  func.func @_conv_kernel_stacked(%arg0: i32, %arg1: i32, %arg2: memref<1x8x256xf32, #tpu.memory_space<vmem>>, %arg3: memref<8x72xf32, #tpu.memory_space<vmem>>, %arg4: memref<8x1xf32, #tpu.memory_space<vmem>>, %arg5: memref<1x8x256xf32, #tpu.memory_space<vmem>>, %arg6: memref<72x256xf32, #tpu.memory_space<vmem>>) attributes {dimension_semantics = [#tpu.dimension_semantics<parallel>, #tpu.dimension_semantics<arbitrary>], iteration_bounds = array<i64: 2, 1>, scalar_prefetch = 0 : i64, scratch_operands = 1 : i64, tpu.core_type = #tpu.core_type<tc>, window_params = [{transform_indices = @transform_0, window_bounds = array<i64: 1, 8, 256>}, {transform_indices = @transform_1, window_bounds = array<i64: 8, 72>}, {transform_indices = @transform_2, window_bounds = array<i64: 8, 1>}, {transform_indices = @transform_3, window_bounds = array<i64: 1, 8, 256>}]} {
    %c0_i32 = arith.constant 0 : i32
    %0 = arith.cmpi eq, %arg1, %c0_i32 : i32
    %1 = arith.extui %0 : i1 to i32
    %c0_i32_0 = arith.constant 0 : i32
    %2 = arith.cmpi ne, %1, %c0_i32_0 : i32
    scf.if %2 {
      %c0_9 = arith.constant 0 : index
      %c0_10 = arith.constant 0 : index
      %c0_11 = arith.constant 0 : index
      %12 = vector.load %arg2[%c0_9, %c0_10, %c0_11] : memref<1x8x256xf32, #tpu.memory_space<vmem>>, vector<1x8x256xf32>
      %13 = vector.shape_cast %12 : vector<1x8x256xf32> to vector<8x256xf32>
      %14 = tpu.iota {dimensions = array<i32: 1>} : vector<1x256xi32>
      %c16_i32 = arith.constant 16 : i32
      %c0_i32_12 = arith.constant 0 : i32
      %15 = arith.cmpi eq, %c16_i32, %c0_i32_12 : i32
      %c1_i32 = arith.constant 1 : i32
      %16 = arith.select %15, %c1_i32, %c16_i32 : i32
      %17 = vector.broadcast %16 : i32 to vector<1x256xi32>
      %18 = arith.remsi %14, %17 : vector<1x256xi32>
      %c0_i32_13 = arith.constant 0 : i32
      %19 = vector.broadcast %c0_i32_13 : i32 to vector<1x256xi32>
      %20 = arith.cmpi ne, %18, %19 : vector<1x256xi32>
      %c0_i32_14 = arith.constant 0 : i32
      %21 = vector.broadcast %c0_i32_14 : i32 to vector<1x256xi32>
      %22 = arith.cmpi slt, %18, %21 : vector<1x256xi32>
      %c0_i32_15 = arith.constant 0 : i32
      %23 = arith.cmpi slt, %16, %c0_i32_15 : i32
      %24 = vector.broadcast %23 : i1 to vector<1x256xi1>
      %25 = vector.broadcast %24 : vector<1x256xi1> to vector<1x256xi1>
      %26 = arith.xori %22, %25 : vector<1x256xi1>
      %27 = arith.andi %26, %20 : vector<1x256xi1>
      %28 = vector.broadcast %16 : i32 to vector<1x256xi32>
      %29 = arith.addi %18, %28 : vector<1x256xi32>
      %30 = arith.select %27, %29, %18 : vector<1x256xi1>, vector<1x256xi32>
      %c1_i32_16 = arith.constant 1 : i32
      %31 = vector.broadcast %c1_i32_16 : i32 to vector<1x256xi32>
      %32 = arith.cmpi sge, %30, %31 : vector<1x256xi32>
      %c1_i32_17 = arith.constant 1 : i32
      %33 = tpu.dynamic_rotate %13 by %c1_i32_17 dim 1 : vector<8x256xf32>, i32 -> vector<8x256xf32>
      %c241_i32 = arith.constant 241 : i32
      %34 = tpu.dynamic_rotate %13 by %c241_i32 dim 1 : vector<8x256xf32>, i32 -> vector<8x256xf32>
      %35 = vector.shape_cast %32 : vector<1x256xi1> to vector<1x256xi1>
      %36 = vector.broadcast %35 : vector<1x256xi1> to vector<8x256xi1>
      %37 = arith.select %36, %33, %34 : vector<8x256xi1>, vector<8x256xf32>
      %c16_i32_18 = arith.constant 16 : i32
      %38 = tpu.dynamic_rotate %37 by %c16_i32_18 dim 1 : vector<8x256xf32>, i32 -> vector<8x256xf32>
      %c0_19 = arith.constant 0 : index
      %c0_20 = arith.constant 0 : index
      %39 = vector.load %arg6[%c0_19, %c0_20] : memref<72x256xf32, #tpu.memory_space<vmem>>, vector<8x256xf32>
      tpu.vector_store %arg6[%c0_19, %c0_20], %38 {strides = array<i32>} : memref<72x256xf32, #tpu.memory_space<vmem>>, vector<8x256xf32>,
      %c24 = arith.constant 24 : index
      %c0_21 = arith.constant 0 : index
      %40 = vector.load %arg6[%c24, %c0_21] : memref<72x256xf32, #tpu.memory_space<vmem>>, vector<8x256xf32>
      tpu.vector_store %arg6[%c24, %c0_21], %37 {strides = array<i32>} : memref<72x256xf32, #tpu.memory_space<vmem>>, vector<8x256xf32>,
      %c240_i32 = arith.constant 240 : i32
      %41 = tpu.dynamic_rotate %37 by %c240_i32 dim 1 : vector<8x256xf32>, i32 -> vector<8x256xf32>
      %c48 = arith.constant 48 : index
      %c0_22 = arith.constant 0 : index
      %42 = vector.load %arg6[%c48, %c0_22] : memref<72x256xf32, #tpu.memory_space<vmem>>, vector<8x256xf32>
      tpu.vector_store %arg6[%c48, %c0_22], %41 {strides = array<i32>} : memref<72x256xf32, #tpu.memory_space<vmem>>, vector<8x256xf32>,
      %c16_i32_23 = arith.constant 16 : i32
      %43 = tpu.dynamic_rotate %13 by %c16_i32_23 dim 1 : vector<8x256xf32>, i32 -> vector<8x256xf32>
      %c8 = arith.constant 8 : index
      %c0_24 = arith.constant 0 : index
      %44 = vector.load %arg6[%c8, %c0_24] : memref<72x256xf32, #tpu.memory_space<vmem>>, vector<8x256xf32>
      tpu.vector_store %arg6[%c8, %c0_24], %43 {strides = array<i32>} : memref<72x256xf32, #tpu.memory_space<vmem>>, vector<8x256xf32>,
      %c32 = arith.constant 32 : index
      %c0_25 = arith.constant 0 : index
      %45 = vector.load %arg6[%c32, %c0_25] : memref<72x256xf32, #tpu.memory_space<vmem>>, vector<8x256xf32>
      tpu.vector_store %arg6[%c32, %c0_25], %13 {strides = array<i32>} : memref<72x256xf32, #tpu.memory_space<vmem>>, vector<8x256xf32>,
      %c240_i32_26 = arith.constant 240 : i32
      %46 = tpu.dynamic_rotate %13 by %c240_i32_26 dim 1 : vector<8x256xf32>, i32 -> vector<8x256xf32>
      %c56 = arith.constant 56 : index
      %c0_27 = arith.constant 0 : index
      %47 = vector.load %arg6[%c56, %c0_27] : memref<72x256xf32, #tpu.memory_space<vmem>>, vector<8x256xf32>
      tpu.vector_store %arg6[%c56, %c0_27], %46 {strides = array<i32>} : memref<72x256xf32, #tpu.memory_space<vmem>>, vector<8x256xf32>,
      %c15_i32 = arith.constant 15 : i32
      %48 = vector.broadcast %c15_i32 : i32 to vector<1x256xi32>
      %49 = arith.cmpi slt, %30, %48 : vector<1x256xi32>
      %c255_i32 = arith.constant 255 : i32
      %50 = tpu.dynamic_rotate %13 by %c255_i32 dim 1 : vector<8x256xf32>, i32 -> vector<8x256xf32>
      %c15_i32_28 = arith.constant 15 : i32
      %51 = tpu.dynamic_rotate %13 by %c15_i32_28 dim 1 : vector<8x256xf32>, i32 -> vector<8x256xf32>
      %52 = vector.shape_cast %49 : vector<1x256xi1> to vector<1x256xi1>
      %53 = vector.broadcast %52 : vector<1x256xi1> to vector<8x256xi1>
      %54 = arith.select %53, %50, %51 : vector<8x256xi1>, vector<8x256xf32>
      %c16_i32_29 = arith.constant 16 : i32
      %55 = tpu.dynamic_rotate %54 by %c16_i32_29 dim 1 : vector<8x256xf32>, i32 -> vector<8x256xf32>
      %c16 = arith.constant 16 : index
      %c0_30 = arith.constant 0 : index
      %56 = vector.load %arg6[%c16, %c0_30] : memref<72x256xf32, #tpu.memory_space<vmem>>, vector<8x256xf32>
      tpu.vector_store %arg6[%c16, %c0_30], %55 {strides = array<i32>} : memref<72x256xf32, #tpu.memory_space<vmem>>, vector<8x256xf32>,
      %c40 = arith.constant 40 : index
      %c0_31 = arith.constant 0 : index
      %57 = vector.load %arg6[%c40, %c0_31] : memref<72x256xf32, #tpu.memory_space<vmem>>, vector<8x256xf32>
      tpu.vector_store %arg6[%c40, %c0_31], %54 {strides = array<i32>} : memref<72x256xf32, #tpu.memory_space<vmem>>, vector<8x256xf32>,
      %c240_i32_32 = arith.constant 240 : i32
      %58 = tpu.dynamic_rotate %54 by %c240_i32_32 dim 1 : vector<8x256xf32>, i32 -> vector<8x256xf32>
      %c64 = arith.constant 64 : index
      %c0_33 = arith.constant 0 : index
      %59 = vector.load %arg6[%c64, %c0_33] : memref<72x256xf32, #tpu.memory_space<vmem>>, vector<8x256xf32>
      tpu.vector_store %arg6[%c64, %c0_33], %58 {strides = array<i32>} : memref<72x256xf32, #tpu.memory_space<vmem>>, vector<8x256xf32>,
    } else {
    }
    %c0 = arith.constant 0 : index
    %c0_1 = arith.constant 0 : index
    %3 = vector.load %arg3[%c0, %c0_1] : memref<8x72xf32, #tpu.memory_space<vmem>>, vector<8x72xf32>
    %c0_2 = arith.constant 0 : index
    %c0_3 = arith.constant 0 : index
    %4 = vector.load %arg6[%c0_2, %c0_3] : memref<72x256xf32, #tpu.memory_space<vmem>>, vector<72x256xf32>
    %cst = arith.constant dense<0.000000e+00> : vector<8x256xf32>
    %5 = tpu.matmul %3, %4, %cst {dimension_numbers = #tpu.dot_dimension_numbers<[1], [0], [0], [1], [0, 0, 1, 1], [], []>} : vector<8x72xf32>, vector<72x256xf32>, vector<8x256xf32> -> vector<8x256xf32>
    %c0_4 = arith.constant 0 : index
    %c0_5 = arith.constant 0 : index
    %6 = vector.load %arg4[%c0_4, %c0_5] : memref<8x1xf32, #tpu.memory_space<vmem>>, vector<8x1xf32>
    %7 = vector.broadcast %6 : vector<8x1xf32> to vector<8x256xf32>
    %8 = arith.addf %5, %7 : vector<8x256xf32>
    %c0_6 = arith.constant 0 : index
    %c0_7 = arith.constant 0 : index
    %c0_8 = arith.constant 0 : index
    %9 = vector.load %arg5[%c0_6, %c0_7, %c0_8] : memref<1x8x256xf32, #tpu.memory_space<vmem>>, vector<1x8x256xf32>
    %10 = vector.shape_cast %9 : vector<1x8x256xf32> to vector<8x256xf32>
    %11 = vector.shape_cast %8 : vector<8x256xf32> to vector<1x8x256xf32>
    tpu.vector_store %arg5[%c0_6, %c0_7, %c0_8], %11 {strides = array<i32>} : memref<1x8x256xf32, #tpu.memory_space<vmem>>, vector<1x8x256xf32>,
    return
  }
  func.func @transform_0(%arg0: i32, %arg1: i32) -> (i32, i32, i32) {
    %c0_i32 = arith.constant 0 : i32
    %c0_i32_0 = arith.constant 0 : i32
    %c0_i32_1 = arith.constant 0 : i32
    return %arg0, %c0_i32, %c0_i32_0 : i32, i32, i32
  }
  func.func @transform_1(%arg0: i32, %arg1: i32) -> (i32, i32) {
    %c0_i32 = arith.constant 0 : i32
    %c0_i32_0 = arith.constant 0 : i32
    return %arg1, %c0_i32 : i32, i32
  }
  func.func @transform_2(%arg0: i32, %arg1: i32) -> (i32, i32) {
    %c0_i32 = arith.constant 0 : i32
    %c0_i32_0 = arith.constant 0 : i32
    return %arg1, %c0_i32 : i32, i32
  }
  func.func @transform_3(%arg0: i32, %arg1: i32) -> (i32, i32, i32) {
    %c0_i32 = arith.constant 0 : i32
    %c0_i32_0 = arith.constant 0 : i32
    return %arg0, %arg1, %c0_i32 : i32, i32, i32
  }
}

</mosaic_0001>

<bundles_post_ra>
// kernel: tpu_custom_call.1
= control target key start
LH: loop header
LB: loop body
LE: loop exit
PB: predicated region body
PF: predicated region fallthrough
CT: control target
= control target key end

     0   :  { %8 = vsyncpa [#allocation4], 0  ;;  %s1120_s0 = inlined_call_operand.hbm [shape: f32[2,8,256], index: 0, kind: input, shape index: {}]   ;;  %s1121_s1 = inlined_call_operand.vmem [shape: f32[8,72], index: 1, kind: input, shape index: {}]   ;;  %s1122_s2 = inlined_call_operand.vmem [shape: f32[8,1], index: 2, kind: input, shape index: {}]   ;;  %s1123_s3 = inlined_call_operand.hbm [shape: f32[2,8,256], index: 3, kind: output, shape index: {}]  }
   0x1   :  { %10 = vsyncpa [#allocation4 + $0x1], 0 }
   0x2   :  { %11 = vsyncpa [#allocation5], 0 }
   0x3   :  { %13 = vsyncpa [#allocation5 + $0x1], 0  ;;  %s885_s12 = smov 0   ;;  %s887_s13 = smov 0  }
   0x4   :  { %s889_s14 = smov 0   ;;  %s891_s15 = smov 0  }
   0x5   :  { %s893_s16 = smov 0   ;;  %s895_s17 = smov 0  }
   0x6 LB: > { %s598_s18 = sadd.s32 4294967295, %s853_s17   ;;  %s599_s19 = sadd.s32 4294967294, %s853_s17   ;;  %s853_s17 = sphi %s895_s17, %s19_s17   ;;  %s849_s16 = sphi %s893_s16, %s1139_s16   ;;  %s845_s15 = sphi %s891_s15, %s1138_s15   ;;  %s841_s14 = sphi %s889_s14, %s1137_s14   ;;  %s837_s13 = sphi %s887_s13, %s1136_s13   ;;  %s833_s12 = sphi %s885_s12, %s1135_s12  }
   0x7   : > { %s31_s20 = sadd.s32 1, %s849_s16  ;;  %s38_s21 = sadd.s32 1, %s841_s14 }
   0x8   : > { %p33_p0 = scmp.ge.s32.totalorder %s31_s20, 2  ;;  %p45_p1 = scmp.ne.s32.totalorder %s841_s14, %s837_s13 }
   0x9   : > { %p46_p2 = scmp.eq.s32.totalorder %s853_s17, 0  ;;  %p51_p3 = scmp.ne.s32.totalorder %s837_s13, %s833_s12 }
   0xa   : > { %s1141_s20 = smov (%p33_p0, %s31_s20), 0  ;;  %p52_p5 = scmp.eq.s32.totalorder %s598_s18, 0 }
   0xb   : > { %p926_p4 = por %p46_p2, %p45_p1  ;;  %s35_s23 = ssub.s32 %s849_s16, %s1141_s20 }
   0xc   : > { %p129_p6 = scmp.eq.s32.totalorder %s598_s18, 1  ;;  %p36_p7 = scmp.eq.s32.totalorder %s35_s23, 0 }
   0xd   : > { %p932_p8 = por %p52_p5, %p51_p3  ;;  %p135_p10 = scmp.eq.s32.totalorder %s599_s19, 1 }
   0xe   : > { %p936_p9 = por %p129_p6, %p45_p1  ;;  %p646_p13 = scmp.lt.s32.totalorder %s853_s17, 2 }
   0xf   : > { %s941_s26 = scalar_select %p36_p7, %s841_s14, %s38_s21  }
  0x10   : > { %s1127_s25 = scalar_select %p936_p9, 1, 0 }
  0x11   : > { %p943_p11 = por %p135_p10, %p51_p3  ;;  %s169_s28 = sand.u32 1, %s841_s14  }
  0x12   : > { %s604_s29 = sshll.u32 %s169_s28, 4  ;;  %s616_s30 = sshll.u32 %s849_s16, 8 }
  0x13   : > { %s1128_s27 = scalar_select %p943_p11, 1, 0 }
  0x14   : > { %s954_s6 = scalar_lea.hbm %s1120_s0, %s616_s30  ;;  %s173_s7 = scalar_lea.vmem [#allocation3], %s604_s29 }
  0x15   : > { %s181_s8 = sshll.u32 %s173_s7, 4  ;;  %p960_p0 = pnand %p646_p13, %p926_p4  ;;  %s956_s8 = int_to_ptr.vmem [resolvable:$true] %s181_s8 }
  0x16   : > { %s170_s10 = scalar_lea.sflag [#allocation4], %s169_s28  ;;  %s741_s11 = scalar_lea.hbm %s954_s6, 256 }
  0x17   : > { %p742_p3 = scmp.ne.s32.totalorder %s954_s6, %s741_s11  ;;  %p743_p5 = pneg %p960_p0 }
  0x18   : > { %s746_s21 = scalar_lea.hbm %s1120_s0, 512  ;;  %p747_p4 = scmp.lt.u32.totalorder %s954_s6, %s1120_s0 }
  0x19   : > { %p744_p6 = pnand %p743_p5, %p742_p3  ;;  %p748_p10 = scmp.lt.u32.totalorder %s746_s21, %s741_s11 }
  0x1a   : > { %p750_p12 = scmp.lt.u32.totalorder %s741_s11, %s954_s6 }
  0x1b   : > { %p745_p7 = pneg %p744_p6  ;;  %p749_p13 = por %p748_p10, %p747_p4 }
  0x1d   : > { %p751_p1 = por %p750_p12, %p749_p13 }
  0x1f   : > { %p752_p2 = pnand %p751_p1, %p745_p7 }
  0x21   : > { %755 = shalt.err (!%p752_p2)
}
  0x22   : > { %s756_s28 = scalar_lea.vmem %s956_s8, 256  ;;  %s855_s29 = smov [#allocation3]  }
  0x23   : > { %p757_p3 = scmp.ne.s32.totalorder %s956_s8, %s756_s28  ;;  %s761_s30 = sshll.u32 %s855_s29, 4  ;;  %s762_s30 = int_to_ptr.vmem [resolvable:$false] %s761_s30 }
  0x24   : > { %s763_s4 = scalar_lea.vmem %s762_s30, 512  ;;  %p764_p9 = scmp.lt.s32.totalorder %s956_s8, %s762_s30 }
  0x25   : > { %p759_p6 = pnand %p757_p3, %p743_p5  ;;  %p765_p4 = scmp.lt.s32.totalorder %s763_s4, %s756_s28 }
  0x27   : > { %p760_p11 = pneg %p759_p6  ;;  %p766_p10 = por %p765_p4, %p764_p9 }
  0x29   : > { %p767_p12 = pnand %p766_p10, %p760_p11 }
  0x2b   : > { %770 = shalt.err (!%p767_p12)
}
  0x2c   : > { %641 = dma.hbm_to_vmem [thread:$0]  (!%p960_p0), %s954_s6, 256, %s956_s8, %s170_s10  }
  0x2d   : > { %p1130_p1 = scmp.lt.s32.totalorder %s853_s17, 3  ;;  %p1131_p2 = scmp.ge.s32.totalorder %s853_s17, 1 }
  0x2f   : > { %p187_p5 = pnand %p1131_p2, %p1130_p1 }
  0x30   : > { %s996_s5 = sand.u32 (!%p187_p5), 1, %s837_s13  }
  0x31   : > { %190 = sbr.rel (%p187_p5) target bundleno = 552 (0x228), region = 32  ;;  %s608_s7 = sshll.u32 (!%p187_p5), %s996_s5, 4 }
  0x32   : > { %s193_s11 = scalar_lea.sflag (!%p187_p5), [#allocation4], %s996_s5  ;;  %s196_s9 = scalar_lea.vmem (!%p187_p5), [#allocation3], %s608_s7 }
  0x38   : > { %824 = dma.done.wait (%p932_p8), %s193_s11, 256  }
  0x39   : > { %826 = vsyncadd (%p932_p8), %s193_s11, 4294967040  ;;  %v1006_v0 = vld [vmem:[%s196_s9] sm:$0xff]  ;;  %v1008_v1 = vld [vmem:[%s196_s9 + $0x8] sm:$0xff]  ;;  %s856_s6 = smov 127   ;;  %s857_s8 = smov 1   ;;  %v241_v3 = vlaneseq  ;;  %v862_v32 = vmov 0.0  }
  0x3a   : > { %330 = vrot.lane.b32.xlu1 %v1006_v0, %s856_s6  ;;  %v704_v2 = vpack.i.bf16 %v1008_v1, %v1006_v0  ;;  %s858_s10 = smov 113   ;;  %s859_s18 = smov 15   ;;  %461 = vmatprep.mubr.f32.mxu0 %v862_v32  ;;  %v387_v33 = vld [vmem:[%s1122_s2] sm:$0xff]  ;;  %v863_v34 = vmov 0   ;;  %vm393_vm10 = vcmask 588800  }
  0x3b   : > { %s860_s24 = smov 16   ;;  %v1017_v4 = vand.u32 127, %v241_v3  ;;  %s861_s19 = smov 112   ;;  %739 = vset.pattern.permute.xlu1 %v863_v34  ;;  %740 = vset.pattern.permute.xlu0 %v863_v34 }
  0x3c   : > { %705 = vrot.lane.b32.xlu0 %v704_v2, %s857_s8  ;;  %s617_s29 = sshll.u32 %s845_s15, 8  ;;  %s226_s30 = scalar_lea.vmem [#allocation6], %s608_s7 }
  0x3d   : > { %v243_v5 = vadd.s32 128, %v1017_v4  ;;  %v248_v9 = vand.u32 15, %v1017_v4  ;;  %vm274_vm0 = vcmp.lt.s32.totalorder %v1017_v4, 1  ;;  %vm334_vm1 = vcmp.lt.s32.totalorder %v1017_v4, 127  ;;  %s487_s4 = sshll.u32 %s226_s30, 4  ;;  %s471_s15 = scalar_lea.sflag [#allocation5], %s996_s5  ;;  %s1073_s4 = int_to_ptr.vmem [resolvable:$true] %s487_s4 }
  0x3e   : > { %332 = vrot.lane.b32.xlu1 %v1008_v1, %s856_s6  ;;  %vm281_vm2 = vcmp.lt.s32.totalorder %v1017_v4, 113  ;;  %vm341_vm6 = vcmp.lt.s32.totalorder %v1017_v4, 15  ;;  %vm294_vm8 = vcmp.lt.s32.totalorder %v1017_v4, 16  ;;  %vm305_vm9 = vcmp.lt.s32.totalorder %v1017_v4, 112  ;;  %s1071_s6 = scalar_lea.hbm %s1123_s3, %s617_s29  ;;  %s771_s8 = scalar_lea.vmem %s1073_s4, 256 }
  0x3f   : > { %v255_v8 = vand.u32 15, %v243_v5  ;;  %vm268_vm3 = vcmp.ge.s32.totalorder %v248_v9, 1  ;;  %vm328_vm7 = vcmp.lt.s32.totalorder %v248_v9, 15  ;;  %p772_p8 = scmp.ne.s32.totalorder %s1073_s4, %s771_s8  ;;  %p1132_p9 = scmp.ne.s32.totalorder %s1127_s25, 0 }
  0x40   : > { %710 = vrot.lane.b32.xlu0 %v704_v2, %s858_s10  ;;  %s864_s7 = smov [#allocation6]  }
  0x41   : > { %vm269_vm4 = vcmp.ge.s32.totalorder %v255_v8, 1  ;;  %vm329_vm5 = vcmp.lt.s32.totalorder %v255_v8, 15  ;;  %v368_v8 = vld [vmem:[%s1121_s1] sm:$0xff]  ;;  %p773_p11 = pnand %p772_p8, %p1132_p9  ;;  %s775_s10 = sshll.u32 %s864_s7, 4  ;;  %s776_s10 = int_to_ptr.vmem [resolvable:$false] %s775_s10 }
  0x42   : > { %339 = vrot.lane.b32.xlu1 %v1008_v1, %s859_s18  ;;  %p778_p7 = scmp.lt.s32.totalorder %s1073_s4, %s776_s10 }
  0x43   : > { %p774_p0 = pneg %p773_p11 }
  0x44   : > { %337 = vrot.lane.b32.xlu0 %v1006_v0, %s859_s18  ;;  %s777_s18 = scalar_lea.vmem %s776_s10, 512 }
  0x45   : > { %p779_p13 = scmp.lt.s32.totalorder %s777_s18, %s771_s8 }
  0x46   : > { %715 = vrot.lane.b32.xlu1 %v704_v2, %s860_s24 }
  0x47   : > { %p780_p3 = por %p779_p13, %p778_p7 }
  0x49   : > { %p781_p6 = pnand %p780_p3, %p774_p0 }
  0xac   : > { %v331_v6 = vpop.permute.xlu1 %330 }
  0xae   : > { %v706_v7 = vpop.permute.xlu0 %705 }
  0xaf   : > { %v708_v11 = vunpack.i.h.bf16 %v706_v7  ;;  %v707_v12 = vunpack.i.l.bf16 %v706_v7 }
  0xb0   : > { %v333_v10 = vpop.permute.xlu1 %332 }
  0xb1   : > { %v275_v17 = vsel %vm274_vm0, %v707_v12, %v708_v11  ;;  %v276_v18 = vsel %vm274_vm0, %v708_v11, %v707_v12  ;;  %v335_v21 = vsel %vm334_vm1, %v331_v6, %v333_v10  ;;  %v336_v22 = vsel %vm334_vm1, %v333_v10, %v331_v6 }
  0xb2   : > { %v711_v13 = vpop.permute.xlu0 %710 }
  0xb3   : > { %v713_v14 = vunpack.i.h.bf16 %v711_v13  ;;  %v712_v15 = vunpack.i.l.bf16 %v711_v13 }
  0xb4   : > { %v340_v16 = vpop.permute.xlu1 %339 }
  0xb5   : > { %v282_v19 = vsel %vm281_vm2, %v712_v15, %v713_v14  ;;  %v283_v20 = vsel %vm281_vm2, %v713_v14, %v712_v15 }
  0xb6   : > { %v338_v23 = vpop.permute.xlu0 %337  ;;  %v288_v24 = vsel %vm268_vm3, %v276_v18, %v282_v19  ;;  %v289_v25 = vsel %vm269_vm4, %v275_v17, %v283_v20 }
  0xb7   : > { %v342_v26 = vsel %vm341_vm6, %v338_v23, %v340_v16  ;;  %v343_v27 = vsel %vm341_vm6, %v340_v16, %v338_v23  ;;  %v729_v28 = vpack.i.bf16 %v289_v25, %v288_v24 }
  0xb8   : > { %v349_v29 = vsel %vm329_vm5, %v336_v22, %v342_v26  ;;  %v348_v30 = vsel %vm328_vm7, %v335_v21, %v343_v27  ;;  %v716_v35 = vpop.permute.xlu1 %715 }
  0xb9   : > { %730 = vrot.lane.b32.xlu1 %v729_v28, %s861_s19  ;;  %720 = vrot.lane.b32.xlu0 %v729_v28, %s860_s24  ;;  %v724_v31 = vpack.i.bf16 %v349_v29, %v348_v30  ;;  %v718_v36 = vunpack.i.h.bf16 %v716_v35  ;;  %v717_v37 = vunpack.i.l.bf16 %v716_v35  ;;  %v626_v60 = vpack.c.bf16 %v349_v29, %v1008_v1 }
  0xba   : > { %v628_v62 = vpack.c.bf16 %v348_v30, %v1006_v0 }
  0xbb   : > { %v314_v41 = vsel %vm294_vm8, %v717_v37, %v718_v36  ;;  %v315_v42 = vsel %vm294_vm8, %v718_v36, %v717_v37 }
  0xbd   : > { %360 = vrot.lane.b32.xlu1 %v348_v30, %s861_s19  ;;  %725 = vrot.lane.b32.xlu0 %v724_v31, %s860_s24 }
  0xc1   : > { %735 = vrot.lane.b32.xlu0 %v704_v2, %s861_s19  ;;  %390 = vperm.xlu1 %739, %v387_v33  }
  0xc5   : > { %362 = vrot.lane.b32.xlu0 %v349_v29, %s861_s19 }
 0x12b   : > { %v721_v38 = vpop.permute.xlu0 %720  ;;  %v731_v50 = vpop.permute.xlu1 %730 }
 0x12c   : > { %v723_v39 = vunpack.i.h.bf16 %v721_v38  ;;  %v722_v40 = vunpack.i.l.bf16 %v721_v38  ;;  %v733_v56 = vunpack.i.h.bf16 %v731_v50  ;;  %v732_v57 = vunpack.i.l.bf16 %v731_v50 }
 0x12e   : > { %v295_v43 = vsel %vm294_vm8, %v722_v40, %v723_v39  ;;  %v296_v44 = vsel %vm294_vm8, %v723_v39, %v722_v40  ;;  %v307_v63 = vsel %vm305_vm9, %v733_v56, %v732_v57  ;;  %v306_v5 = vsel %vm305_vm9, %v732_v57, %v733_v56 }
 0x12f   : > { %v726_v45 = vpop.permute.xlu0 %725  ;;  %v618_v46 = vpack.c.bf16 %v314_v41, %v295_v43  ;;  %v620_v47 = vpack.c.bf16 %v315_v42, %v296_v44  ;;  %v361_v7 = vpop.permute.xlu1 %360 }
 0x130   : > { %v728_v48 = vunpack.i.h.bf16 %v726_v45  ;;  %v727_v49 = vunpack.i.l.bf16 %v726_v45 }
 0x131   : > { %619 = vmatprep.subr.bf16.mxu0 %v618_v46 }
 0x132   : > { %621 = vmatpush1.bf16.msra.mxu0 %v620_v47  ;;  %v354_v51 = vsel %vm294_vm8, %v727_v49, %v728_v48  ;;  %v355_v52 = vsel %vm294_vm8, %v728_v48, %v727_v49 }
 0x133   : > { %v736_v53 = vpop.permute.xlu0 %735  ;;  %v622_v54 = vpack.c.bf16 %v289_v25, %v354_v51  ;;  %v624_v55 = vpack.c.bf16 %v288_v24, %v355_v52 }
 0x134   : > { %v738_v58 = vunpack.i.h.bf16 %v736_v53  ;;  %v737_v59 = vunpack.i.l.bf16 %v736_v53 }
 0x135   : > { %623 = vmatprep.subr.bf16.mxu0 %v622_v54 }
 0x136   : > { %625 = vmatpush1.bf16.msra.mxu0 %v624_v55  ;;  %v325_v61 = vsel %vm305_vm9, %v738_v58, %v737_v59  ;;  %v324_v3 = vsel %vm305_vm9, %v737_v59, %v738_v58 }
 0x137   : > { %627 = vmatprep.subr.bf16.mxu0 %v626_v60  ;;  %v630_v2 = vpack.c.bf16 %v325_v61, %v307_v63  ;;  %v363_v1 = vpop.permute.xlu0 %362  ;;  %v632_v6 = vpack.c.bf16 %v324_v3, %v306_v5 }
 0x138   : > { %v365_v0 = vsel %vm305_vm9, %v363_v1, %v361_v7  ;;  %v364_v9 = vsel %vm305_vm9, %v361_v7, %v363_v1 }
 0x13a   : > { %629 = vmatpush1.bf16.msra.mxu0 %v628_v62 }
 0x13b   : > { %631 = vmatprep.subr.bf16.mxu0 %v630_v2 }
 0x13e   : > { %633 = vmatpush1.bf16.msra.mxu0 %v632_v6 }
 0x13f   : > { %413 = vmatprep.subr.mxu0 %v365_v0 }
 0x140   : > { %v391_v10 = vpop.permute.xlu1 %390 }
 0x142   : > { %414 = vmatpush1.msra.mxu0 %v364_v9 }
 0x143   : > { %610 = vmatmul.mubr.msk.f32.vlgmr.msra.gmra.mrb[0].mxu0 %vm393_vm10, %v368_v8 }
 0x216   : > { %v463_v11 = vpop.f32.mrb[0].mxu0 }
 0x217   : > { %v464_v12 = vadd.f32 %v463_v11, %v391_v10  ;;  %v465_v13 = vpop.f32.mrb[1].mxu0 }
 0x218   : > { %v466_v14 = vadd.f32 %v465_v13, %v391_v10 }
 0x219   : > { %468 = vst [vmem:[%s226_s30] sm:$0xff] %v464_v12 }
 0x21a   : > { %469 = vst [vmem:[%s226_s30 + $0x8] sm:$0xff] %v466_v14 }
 0x21b   : > { %784 = shalt.err (!%p781_p6)
}
 0x21c   : > { %s785_s5 = scalar_lea.hbm %s1071_s6, 256  ;;  %s789_s21 = scalar_lea.hbm %s1123_s3, 512 }
 0x21d   : > { %p786_p4 = scmp.ne.s32.totalorder %s1071_s6, %s785_s5  ;;  %p790_p1 = scmp.lt.u32.totalorder %s1071_s6, %s1123_s3 }
 0x21e   : > { %p791_p2 = scmp.lt.u32.totalorder %s789_s21, %s785_s5  ;;  %p793_p8 = scmp.lt.u32.totalorder %s785_s5, %s1071_s6 }
 0x21f   : > { %p787_p10 = pnand %p786_p4, %p1132_p9 }
 0x220   : > { %p792_p5 = por %p791_p2, %p790_p1 }
 0x221   : > { %p788_p12 = pneg %p787_p10 }
 0x222   : > { %p794_p11 = por %p793_p8, %p792_p5 }
 0x224   : > { %p795_p0 = pnand %p794_p11, %p788_p12 }
 0x226   : > { %798 = shalt.err (!%p795_p0)
}
 0x227   : > { %636 = dma.vmem_to_hbm [thread:$0]  (%p1132_p9), %s1073_s4, 256, %s1071_s6, %s471_s15  }
 0x228 PF: > { %s499_s28 = sand.u32 1, %s833_s12   ;;  %p1133_p7 = scmp.ne.s32.totalorder %s1128_s27, 0 }
 0x229   : > { %p1134_p13 = scmp.ge.s32.totalorder %s853_s17, 2  ;;  %s500_s29 = scalar_lea.sflag [#allocation5], %s499_s28 }
 0x22b   : > { %p643_p3 = pnand %p1134_p13, %p1133_p7 }
 0x22d   : > { %828 = dma.done.wait (!%p643_p3), %s500_s29, 256  }
 0x22e   : > { %830 = vsyncadd (!%p643_p3), %s500_s29, 4294967040  ;;  %s19_s17 = sadd.s32 1, %s853_s17   ;;  %s1135_s12 = smov %s837_s13 }
 0x22f   : > { %p16_p6 = scmp.ge.s32.totalorder %s19_s17, 4   ;;  %s1136_s13 = smov %s841_s14 }
 0x230   : > { %s1137_s14 = smov %s941_s26  ;;  %s1138_s15 = smov %s849_s16 }
 0x231   : > { %s1139_s16 = smov %s1141_s20  ;;  %18 = sbr.rel (!%p16_p6) target bundleno = 6 (0x6), region = 87 }
 0x238   :  { %505 = vsyncpa [#allocation4], 1 }
 0x239   :  { %507 = vsyncpa [#allocation4 + $0x1], 1 }
 0x23a   :  { %508 = vsyncpa [#allocation5], 1 }
 0x23b   :  { %510 = vsyncpa [#allocation5 + $0x1], 1 }

</bundles_post_ra>
